<compile_context>
chip_gen: v6e
topology: v6e:2x2x1
jax: 0.10.0
libtpu: 0.0.40
codegen_flags: <defaults>
</compile_context>

<pallas_src>
import jax
import jax.numpy as jnp
from jax.experimental import pallas as pl
from jax.experimental.pallas import tpu as pltpu

# ---- problem sizes (CartPole-like synthetic env) --------------------------
STATE_NUMBER = 4     # env.observation_space.shape[0]
ACTION_NUMBER = 2    # env.action_space.n
H1 = 20
H2 = 10


def _round_up(n, m):
    return ((n + m - 1) // m) * m


# Row offsets of each layer inside the packed parameter slabs (8-row aligned).
W1_ROW = 0
W2_ROW = _round_up(W1_ROW + H1, 8)               # 24
W3_ROW = _round_up(W2_ROW + H2, 8)               # 40
SLAB_ROWS = _round_up(W3_ROW + ACTION_NUMBER, 8)  # 48
SLAB_COLS = 128                                   # one full lane tile


def _net_kernel(x_ref, w_ref, b_ref, out_ref):
    """One batch tile: x_ref [S, TB] -> out_ref [A, TB] (feature-major)."""
    x = x_ref[...].astype(jnp.bfloat16)                                  # [S, TB]

    # Slice the resident parameter slabs (offsets are 8-row aligned, lane 0).
    w1 = w_ref[W1_ROW:W1_ROW + H1, :STATE_NUMBER].astype(jnp.bfloat16)   # [20, 4]
    w2 = w_ref[W2_ROW:W2_ROW + H2, :H1].astype(jnp.bfloat16)             # [10, 20]
    w3 = w_ref[W3_ROW:W3_ROW + ACTION_NUMBER, :H2].astype(jnp.bfloat16)  # [2, 10]
    b1 = b_ref[W1_ROW:W1_ROW + H1, :]                                    # [20, 1]
    b2 = b_ref[W2_ROW:W2_ROW + H2, :]                                    # [10, 1]
    b3 = b_ref[W3_ROW:W3_ROW + ACTION_NUMBER, :]                         # [2, 1]

    # Linear 1 + ReLU        (MXU: bf16 x bf16 -> f32 accumulate)
    h1 = jnp.dot(w1, x, preferred_element_type=jnp.float32) + b1         # [20, TB]
    h1 = jnp.maximum(h1, 0.0).astype(jnp.bfloat16)

    # Linear 2 + Sigmoid     (divide -> EUP approximate reciprocal)
    h2 = jnp.dot(w2, h1, preferred_element_type=jnp.float32) + b2        # [10, TB]
    h2 = pl.reciprocal(1.0 + jnp.exp(-h2), approx=True).astype(jnp.bfloat16)

    # Linear 3 -> logits
    logits = jnp.dot(w3, h2, preferred_element_type=jnp.float32) + b3    # [A, TB]

    if ACTION_NUMBER == 2:
        # 2-way softmax == sigmoid of the logit difference (no XLU reduce).
        d = logits[1:2, :] - logits[0:1, :]                              # [1, TB]
        p0 = pl.reciprocal(1.0 + jnp.exp(d), approx=True)
        probs = jnp.concatenate([p0, 1.0 - p0], axis=0)                  # [2, TB]
    else:
        m = jnp.max(logits, axis=0, keepdims=True)
        e = jnp.exp(logits - m)
        probs = e * pl.reciprocal(jnp.sum(e, axis=0, keepdims=True), approx=True)

    out_ref[...] = probs.astype(out_ref.dtype)


def pack_params(params):
    """Pack (w1,b1,w2,b2,w3,b3) (PyTorch [out,in] layout) into 2 slabs."""
    w1, b1, w2, b2, w3, b3 = params
    w_slab = jnp.zeros((SLAB_ROWS, SLAB_COLS), jnp.float32)
    w_slab = w_slab.at[W1_ROW:W1_ROW + H1, :STATE_NUMBER].set(w1)
    w_slab = w_slab.at[W2_ROW:W2_ROW + H2, :H1].set(w2)
    w_slab = w_slab.at[W3_ROW:W3_ROW + ACTION_NUMBER, :H2].set(w3)

    b_slab = jnp.zeros((SLAB_ROWS, 1), jnp.float32)
    b_slab = b_slab.at[W1_ROW:W1_ROW + H1, 0].set(b1)
    b_slab = b_slab.at[W2_ROW:W2_ROW + H2, 0].set(b2)
    b_slab = b_slab.at[W3_ROW:W3_ROW + ACTION_NUMBER, 0].set(b3)
    return w_slab, b_slab


def net_forward(x, packed_params, *, tile_b=2048):
    """x: [B, STATE_NUMBER] f32 -> softmax probs [B, ACTION_NUMBER] f32."""
    w_slab, b_slab = packed_params
    B = x.shape[0]
    tb = int(tile_b)
    b_pad = _round_up(max(B, 1), tb)          # pad batch -> exact tile multiple

    # Feature-major, zero-padded batch (lane axis = batch).
    x_t = jnp.zeros((STATE_NUMBER, b_pad), jnp.float32)
    x_t = x_t.at[:, :B].set(x.T.astype(jnp.float32))

    out_t = pl.pallas_call(
        _net_kernel,
        out_shape=jax.ShapeDtypeStruct((ACTION_NUMBER, b_pad), jnp.float32),
        grid_spec=pltpu.PrefetchScalarGridSpec(
            num_scalar_prefetch=0,
            grid=(b_pad // tb,),
            in_specs=[
                pl.BlockSpec((STATE_NUMBER, tb), lambda i: (0, i)),       # x tile
                pl.BlockSpec((SLAB_ROWS, SLAB_COLS), lambda i: (0, 0)),   # weights (resident)
                pl.BlockSpec((SLAB_ROWS, 1), lambda i: (0, 0)),           # biases (resident)
            ],
            out_specs=pl.BlockSpec((ACTION_NUMBER, tb), lambda i: (0, i)),
        ),
        compiler_params=pltpu.CompilerParams(
            dimension_semantics=("parallel",)),   # shard batch tiles across v7x TCs
    )(x_t, w_slab, b_slab)

    return out_t[:, :B].T                      # back to [B, ACTION_NUMBER]


def init_params(key):
    """Mirror the PyTorch module: weights ~ N(0, 0.1) (explicit override),
    biases keep nn.Linear's default U(-1/sqrt(fan_in), +1/sqrt(fan_in))."""
    ks = jax.random.split(key, 6)

    def w(k, fan_out, fan_in):                       # PyTorch layout [out, in]
        return (0.1 * jax.random.normal(k, (fan_out, fan_in))).astype(jnp.float32)

    def b(k, fan_in, fan_out):
        bound = 1.0 / (fan_in ** 0.5)
        return jax.random.uniform(k, (fan_out,), minval=-bound,
                                  maxval=bound).astype(jnp.float32)

    w1 = w(ks[0], H1, STATE_NUMBER)
    b1 = b(ks[1], STATE_NUMBER, H1)
    w2 = w(ks[2], H2, H1)
    b2 = b(ks[3], H1, H2)
    w3 = w(ks[4], ACTION_NUMBER, H2)
    b3 = b(ks[5], H2, ACTION_NUMBER)
    return (w1, b1, w2, b2, w3, b3)


def _reference_forward(x, params):
    """Pure-JAX f32 reference (same math as the PyTorch module)."""
    w1, b1, w2, b2, w3, b3 = params
    h1 = jnp.maximum(x @ w1.T + b1, 0.0)
    h2 = jax.nn.sigmoid(h1 @ w2.T + b2)
    return jax.nn.softmax(h2 @ w3.T + b3, axis=-1)


if __name__ == "__main__":
    key = jax.random.PRNGKey(0)
    k_params, k_x1, k_x2 = jax.random.split(key, 3)

    params = init_params(k_params)
    packed = pack_params(params)

    fwd = jax.jit(net_forward)

    # Small shape consistent with the module (CartPole-like: state=4, actions=2).
    x_small = jax.random.normal(k_x1, (2, STATE_NUMBER), dtype=jnp.float32)
    out_small = jax.block_until_ready(fwd(x_small, packed))
    ref_small = _reference_forward(x_small, params)
    assert out_small.shape == (2, ACTION_NUMBER)
    # bf16 matmul inputs + approx reciprocals -> loose-but-meaningful tolerance.
    assert jnp.allclose(out_small, ref_small, atol=3e-2, rtol=0.0)
    assert jnp.allclose(jnp.sum(out_small, axis=-1), 1.0, atol=1e-3)

    # Exercise multi-step grid + batch padding (B=300, tile=128 -> grid of 3).
    x_big = jax.random.normal(k_x2, (300, STATE_NUMBER), dtype=jnp.float32)
    out_big = jax.block_until_ready(net_forward(x_big, packed, tile_b=128))
    ref_big = _reference_forward(x_big, params)
    assert out_big.shape == (300, ACTION_NUMBER)
    assert jnp.allclose(out_big, ref_big, atol=3e-2, rtol=0.0)
    assert jnp.allclose(jnp.sum(out_big, axis=-1), 1.0, atol=1e-3)

    print("KERNEL_OK")
</pallas_src>

<mosaic_0001>
module attributes {stable_mosaic.version = 11 : i64} {
  func.func @_net_kernel(%arg0: i32, %arg1: memref<4x2048xf32, #tpu.memory_space<vmem>>, %arg2: memref<48x128xf32, #tpu.memory_space<vmem>>, %arg3: memref<48x1xf32, #tpu.memory_space<vmem>>, %arg4: memref<2x2048xf32, #tpu.memory_space<vmem>>) attributes {dimension_semantics = [#tpu.dimension_semantics<parallel>], iteration_bounds = array<i64: 1>, scalar_prefetch = 0 : i64, scratch_operands = 0 : i64, tpu.core_type = #tpu.core_type<tc>, window_params = [{transform_indices = @transform_0, window_bounds = array<i64: 4, 2048>}, {pipeline_mode = #tpu.pipeline_mode<synchronous>, transform_indices = @transform_1, window_bounds = array<i64: 48, 128>}, {pipeline_mode = #tpu.pipeline_mode<synchronous>, transform_indices = @transform_2, window_bounds = array<i64: 48, 1>}, {transform_indices = @transform_3, window_bounds = array<i64: 2, 2048>}]} {
    %c0 = arith.constant 0 : index
    %c0_0 = arith.constant 0 : index
    %0 = vector.load %arg1[%c0, %c0_0] : memref<4x2048xf32, #tpu.memory_space<vmem>>, vector<4x2048xf32>
    %1 = arith.truncf %0 : vector<4x2048xf32> to vector<4x2048xbf16>
    %c0_1 = arith.constant 0 : index
    %c0_2 = arith.constant 0 : index
    %2 = vector.load %arg2[%c0_1, %c0_2] : memref<48x128xf32, #tpu.memory_space<vmem>>, vector<20x4xf32>
    %3 = arith.truncf %2 : vector<20x4xf32> to vector<20x4xbf16>
    %c24 = arith.constant 24 : index
    %c0_3 = arith.constant 0 : index
    %4 = vector.load %arg2[%c24, %c0_3] : memref<48x128xf32, #tpu.memory_space<vmem>>, vector<10x20xf32>
    %5 = arith.truncf %4 : vector<10x20xf32> to vector<10x20xbf16>
    %c40 = arith.constant 40 : index
    %c0_4 = arith.constant 0 : index
    %6 = vector.load %arg2[%c40, %c0_4] : memref<48x128xf32, #tpu.memory_space<vmem>>, vector<2x10xf32>
    %7 = arith.truncf %6 : vector<2x10xf32> to vector<2x10xbf16>
    %c0_5 = arith.constant 0 : index
    %c0_6 = arith.constant 0 : index
    %8 = vector.load %arg3[%c0_5, %c0_6] : memref<48x1xf32, #tpu.memory_space<vmem>>, vector<20x1xf32>
    %c24_7 = arith.constant 24 : index
    %c0_8 = arith.constant 0 : index
    %9 = vector.load %arg3[%c24_7, %c0_8] : memref<48x1xf32, #tpu.memory_space<vmem>>, vector<10x1xf32>
    %c40_9 = arith.constant 40 : index
    %c0_10 = arith.constant 0 : index
    %10 = vector.load %arg3[%c40_9, %c0_10] : memref<48x1xf32, #tpu.memory_space<vmem>>, vector<2x1xf32>
    %cst = arith.constant dense<0.000000e+00> : vector<20x2048xf32>
    %11 = tpu.matmul %3, %1, %cst {dimension_numbers = #tpu.dot_dimension_numbers<[1], [0], [0], [1], [0, 0, 1, 1], [], []>} : vector<20x4xbf16>, vector<4x2048xbf16>, vector<20x2048xf32> -> vector<20x2048xf32>
    %12 = vector.broadcast %8 : vector<20x1xf32> to vector<20x2048xf32>
    %13 = arith.addf %11, %12 : vector<20x2048xf32>
    %cst_11 = arith.constant 0.000000e+00 : f32
    %14 = vector.broadcast %cst_11 : f32 to vector<20x2048xf32>
    %15 = arith.maximumf %13, %14 : vector<20x2048xf32>
    %16 = arith.truncf %15 : vector<20x2048xf32> to vector<20x2048xbf16>
    %cst_12 = arith.constant dense<0.000000e+00> : vector<10x2048xf32>
    %17 = tpu.matmul %5, %16, %cst_12 {dimension_numbers = #tpu.dot_dimension_numbers<[1], [0], [0], [1], [0, 0, 1, 1], [], []>} : vector<10x20xbf16>, vector<20x2048xbf16>, vector<10x2048xf32> -> vector<10x2048xf32>
    %18 = vector.broadcast %9 : vector<10x1xf32> to vector<10x2048xf32>
    %19 = arith.addf %17, %18 : vector<10x2048xf32>
    %cst_13 = arith.constant 0.000000e+00 : f32
    %20 = vector.broadcast %cst_13 : f32 to vector<10x2048xf32>
    %21 = arith.subf %20, %19 : vector<10x2048xf32>
    %22 = math.exp %21 : vector<10x2048xf32>
    %cst_14 = arith.constant 1.000000e+00 : f32
    %23 = vector.broadcast %cst_14 : f32 to vector<10x2048xf32>
    %24 = arith.addf %23, %22 : vector<10x2048xf32>
    %25 = tpu.reciprocal %24 {approx = true} : vector<10x2048xf32> -> vector<10x2048xf32>
    %26 = arith.truncf %25 : vector<10x2048xf32> to vector<10x2048xbf16>
    %cst_15 = arith.constant dense<0.000000e+00> : vector<2x2048xf32>
    %27 = tpu.matmul %7, %26, %cst_15 {dimension_numbers = #tpu.dot_dimension_numbers<[1], [0], [0], [1], [0, 0, 1, 1], [], []>} : vector<2x10xbf16>, vector<10x2048xbf16>, vector<2x2048xf32> -> vector<2x2048xf32>
    %28 = vector.broadcast %10 : vector<2x1xf32> to vector<2x2048xf32>
    %29 = arith.addf %27, %28 : vector<2x2048xf32>
    %30 = vector.extract_strided_slice %29 {offsets = [1, 0], sizes = [1, 2048], strides = [1, 1]} : vector<2x2048xf32> to vector<1x2048xf32>
    %31 = vector.extract_strided_slice %29 {offsets = [0, 0], sizes = [1, 2048], strides = [1, 1]} : vector<2x2048xf32> to vector<1x2048xf32>
    %32 = arith.subf %30, %31 : vector<1x2048xf32>
    %33 = math.exp %32 : vector<1x2048xf32>
    %cst_16 = arith.constant 1.000000e+00 : f32
    %34 = vector.broadcast %cst_16 : f32 to vector<1x2048xf32>
    %35 = arith.addf %34, %33 : vector<1x2048xf32>
    %36 = tpu.reciprocal %35 {approx = true} : vector<1x2048xf32> -> vector<1x2048xf32>
    %cst_17 = arith.constant 1.000000e+00 : f32
    %37 = vector.broadcast %cst_17 : f32 to vector<1x2048xf32>
    %38 = arith.subf %37, %36 : vector<1x2048xf32>
    %39 = tpu.concatenate %36, %38 in 0 : vector<1x2048xf32>, vector<1x2048xf32> -> vector<2x2048xf32>
    %c0_18 = arith.constant 0 : index
    %c0_19 = arith.constant 0 : index
    %40 = vector.load %arg4[%c0_18, %c0_19] : memref<2x2048xf32, #tpu.memory_space<vmem>>, vector<2x2048xf32>
    tpu.vector_store %arg4[%c0_18, %c0_19], %39 {strides = array<i32>} : memref<2x2048xf32, #tpu.memory_space<vmem>>, vector<2x2048xf32>,
    return
  }
  func.func @transform_0(%arg0: i32) -> (i32, i32) {
    %c0_i32 = arith.constant 0 : i32
    %c0_i32_0 = arith.constant 0 : i32
    return %c0_i32, %arg0 : i32, i32
  }
  func.func @transform_1(%arg0: i32) -> (i32, i32) {
    %c0_i32 = arith.constant 0 : i32
    %c0_i32_0 = arith.constant 0 : i32
    %c0_i32_1 = arith.constant 0 : i32
    return %c0_i32, %c0_i32_0 : i32, i32
  }
  func.func @transform_2(%arg0: i32) -> (i32, i32) {
    %c0_i32 = arith.constant 0 : i32
    %c0_i32_0 = arith.constant 0 : i32
    %c0_i32_1 = arith.constant 0 : i32
    return %c0_i32, %c0_i32_0 : i32, i32
  }
  func.func @transform_3(%arg0: i32) -> (i32, i32) {
    %c0_i32 = arith.constant 0 : i32
    %c0_i32_0 = arith.constant 0 : i32
    return %c0_i32, %arg0 : i32, i32
  }
}

</mosaic_0001>

<bundles_post_ra>
// kernel: net_forward.1
= control target key start
LH: loop header
LB: loop body
LE: loop exit
PB: predicated region body
PF: predicated region fallthrough
CT: control target
= control target key end

     0   :  { %vm101_vm0 = vcmask 1041408   ;;  %v2171_v2 = vmov 0   ;;  %vm94_vm1 = vcmask 31744   ;;  %vm648_vm2 = vcmask 162816   ;;  %s2543_s0 = inlined_call_operand.vmem [shape: f32[4,2048], index: 0, kind: input, shape index: {}]   ;;  %s2544_s1 = inlined_call_operand.vmem [shape: f32[48,128], index: 1, kind: input, shape index: {}]   ;;  %s2545_s2 = inlined_call_operand.vmem [shape: f32[48,1], index: 2, kind: input, shape index: {}]   ;;  %s2546_s3 = inlined_call_operand.vmem [shape: f32[2,2048], index: 3, kind: output, shape index: {}]  }
   0x1   :  { %v15_v0 = vld [vmem:[%s2543_s0] sm:$0xff]  ;;  %v16_v1 = vld [vmem:[%s2543_s0 + $0x8] sm:$0xff]  ;;  %182 = vmatprep.mubr.bf16.mxu0 %v2171_v2  ;;  %233 = vmatprep.mubr.bf16.mxu1 %v2171_v2  ;;  %v17_v8 = vld [vmem:[%s2543_s0 + $0x10] sm:$0xff]  ;;  %vm1229_vm3 = vcmask 1044480   ;;  %vm1225_vm4 = vcmask 80896   ;;  %vm1798_vm5 = vcmask 1040384  }
   0x2   :  { %v31_v3 = vcombine.high %v15_v0, %v15_v0  ;;  %v32_v4 = vcombine.high %v16_v1, %v16_v1  ;;  %v47_v5 = vpack.c.bf16 %v15_v0, %v15_v0  ;;  %v49_v6 = vpack.c.bf16 %v16_v1, %v16_v1  ;;  %v63_v7 = vld [vmem:[%s2544_s1] sm:$0xff]  ;;  %v18_v9 = vld [vmem:[%s2543_s0 + $0x18] sm:$0xff]  ;;  %1969 = vset.pattern.permute.xlu0 %v2171_v2  ;;  %v64_v10 = vld [vmem:[%s2544_s1 + $0x8] sm:$0xff] }
   0x3   :  { %v33_v11 = vcombine.high %v17_v8, %v17_v8  ;;  %v34_v12 = vcombine.high %v18_v9, %v18_v9  ;;  %v51_v13 = vpack.c.bf16 %v17_v8, %v17_v8  ;;  %v19_v14 = vld [vmem:[%s2543_s0 + $0x20] sm:$0xff]  ;;  %v20_v15 = vld [vmem:[%s2543_s0 + $0x28] sm:$0xff]  ;;  %1970 = vset.pattern.permute.xlu1 %v2171_v2  ;;  %v75_v20 = vld [vmem:[%s2545_s2 + $0x10] sm:$0xf]  ;;  %v53_v23 = vpack.c.bf16 %v18_v9, %v18_v9 }
   0x4   :  { %v48_v16 = vpack.c.bf16 %v31_v3, %v31_v3  ;;  %v50_v17 = vpack.c.bf16 %v32_v4, %v32_v4  ;;  %v103_v18 = vsel %vm101_vm0, %v47_v5, 0  ;;  %v109_v19 = vsel %vm101_vm0, %v49_v6, 0  ;;  %91 = vperm.xlu0 %1969, %v75_v20   ;;  %v73_v27 = vld [vmem:[%s2545_s2] sm:$0xff]  ;;  %v74_v28 = vld [vmem:[%s2545_s2 + $0x8] sm:$0xff]  ;;  %v65_v33 = vld [vmem:[%s2544_s1 + $0x10] sm:$0xf] }
   0x5   :  { %v52_v21 = vpack.c.bf16 %v33_v11, %v33_v11  ;;  %v54_v22 = vpack.c.bf16 %v34_v12, %v34_v12  ;;  %v2228_v24 = vpack.c.bf16 %v64_v10, %v63_v7  ;;  %v35_v25 = vcombine.high %v19_v14, %v19_v14  ;;  %86 = vperm.xlu1 %1970, %v74_v28   ;;  %v77_v34 = vld [vmem:[%s2545_s2 + $0x20] sm:$0x3]  ;;  %v76_v35 = vld [vmem:[%s2545_s2 + $0x18] sm:$0xff]  ;;  %v78_v37 = vld [vmem:[%s2545_s2 + $0x28] sm:$0x3] }
   0x6   :  { %1911 = vmatprep.subr.msk.bf16.mxu0 %vm101_vm0, %v48_v16  ;;  %1914 = vmatprep.subr.msk.bf16.mxu1 %vm101_vm0, %v50_v17  ;;  %v36_v26 = vcombine.high %v20_v15, %v20_v15  ;;  %v115_v29 = vsel %vm101_vm0, %v51_v13, 0  ;;  %v121_v30 = vsel %vm101_vm0, %v53_v23, 0  ;;  %v67_v36 = vpack.c.bf16 %v65_v33, %v65_v33  ;;  %v21_v38 = vld [vmem:[%s2543_s0 + $0x30] sm:$0xff]  ;;  %v22_v39 = vld [vmem:[%s2543_s0 + $0x38] sm:$0xff] }
   0x7   :  { %165 = vmatpush1.bf16.msra.mxu0 %v103_v18  ;;  %216 = vmatpush1.bf16.msra.mxu1 %v109_v19  ;;  %v56_v31 = vpack.c.bf16 %v35_v25, %v35_v25  ;;  %v55_v40 = vpack.c.bf16 %v19_v14, %v19_v14  ;;  %v57_v41 = vpack.c.bf16 %v20_v15, %v20_v15 }
   0x8   :  { %1917 = vmatprep.subr.msk.bf16.mxu0 %vm101_vm0, %v52_v21  ;;  %1920 = vmatprep.subr.msk.bf16.mxu1 %vm101_vm0, %v54_v22  ;;  %v58_v32 = vpack.c.bf16 %v36_v26, %v36_v26  ;;  %v37_v42 = vcombine.high %v21_v38, %v21_v38  ;;  %v38_v43 = vcombine.high %v22_v39, %v22_v39 }
   0x9   :  { %81 = vperm.xlu0 %1969, %v73_v27   ;;  %640 = vperm.xlu1 %1970, %v76_v35   ;;  %v127_v44 = vsel %vm101_vm0, %v55_v40, 0  ;;  %v133_v45 = vsel %vm101_vm0, %v57_v41, 0  ;;  %v59_v48 = vpack.c.bf16 %v21_v38, %v21_v38  ;;  %v61_v49 = vpack.c.bf16 %v22_v39, %v22_v39 }
   0xa   :  { %1912 = vmatmul.mubr.msk.bf16.vlgmr.msra.gmra.mxu0 %vm94_vm1, %v2228_v24  ;;  %1915 = vmatmul.mubr.msk.bf16.vlgmr.msra.gmra.mxu1 %vm94_vm1, %v2228_v24  ;;  %v60_v46 = vpack.c.bf16 %v37_v42, %v37_v42  ;;  %v62_v47 = vpack.c.bf16 %v38_v43, %v38_v43 }
   0xb   :  { %267 = vmatpush1.bf16.msra.mxu0 %v115_v29  ;;  %318 = vmatpush1.bf16.msra.mxu1 %v121_v30  ;;  %v139_v50 = vsel %vm101_vm0, %v59_v48, 0  ;;  %v145_v51 = vsel %vm101_vm0, %v61_v49, 0 }
   0xc   :  { %192 = vmatprep.mubr.bf16.mxu0 %v2171_v2  ;;  %243 = vmatprep.mubr.bf16.mxu1 %v2171_v2 }
   0xd   :  { %1923 = vmatprep.subr.msk.bf16.mxu0 %vm101_vm0, %v56_v31  ;;  %1926 = vmatprep.subr.msk.bf16.mxu1 %vm101_vm0, %v58_v32 }
   0xe   :  { %645 = vperm.xlu0 %1969, %v77_v34   ;;  %1222 = vperm.xlu1 %1970, %v78_v37  }
  0x12   :  { %1913 = vmatmul.mubr.msk.bf16.gmra.mxu0 %vm94_vm1, %v67_v36  ;;  %1916 = vmatmul.mubr.msk.bf16.gmra.mxu1 %vm94_vm1, %v67_v36 }
  0x13   :  { %284 = vmatprep.mubr.bf16.mxu0 %v2171_v2  ;;  %335 = vmatprep.mubr.bf16.mxu1 %v2171_v2 }
  0x1a   :  { %1918 = vmatmul.mubr.msk.bf16.vlgmr.msra.gmra.mxu0 %vm94_vm1, %v2228_v24  ;;  %1921 = vmatmul.mubr.msk.bf16.vlgmr.msra.gmra.mxu1 %vm94_vm1, %v2228_v24 }
  0x1b   :  { %369 = vmatpush1.bf16.msra.mxu0 %v127_v44  ;;  %420 = vmatpush1.bf16.msra.mxu1 %v133_v45  ;;  %v68_v44 = vld [vmem:[%s2544_s1 + $0x18] sm:$0xff]  ;;  %v69_v45 = vld [vmem:[%s2544_s1 + $0x20] sm:$0x3] }
  0x1c   :  { %294 = vmatprep.mubr.bf16.mxu0 %v2171_v2  ;;  %345 = vmatprep.mubr.bf16.mxu1 %v2171_v2 }
  0x1d   :  { %1929 = vmatprep.subr.msk.bf16.mxu0 %vm101_vm0, %v60_v46  ;;  %1932 = vmatprep.subr.msk.bf16.mxu1 %vm101_vm0, %v62_v47 }
  0x22   :  { %1919 = vmatmul.mubr.msk.bf16.gmra.mxu0 %vm94_vm1, %v67_v36  ;;  %1922 = vmatmul.mubr.msk.bf16.gmra.mxu1 %vm94_vm1, %v67_v36 }
  0x23   :  { %386 = vmatprep.mubr.bf16.mxu0 %v2171_v2  ;;  %437 = vmatprep.mubr.bf16.mxu1 %v2171_v2 }
  0x2a   :  { %1924 = vmatmul.mubr.msk.bf16.vlgmr.msra.gmra.mxu0 %vm94_vm1, %v2228_v24  ;;  %1927 = vmatmul.mubr.msk.bf16.vlgmr.msra.gmra.mxu1 %vm94_vm1, %v2228_v24 }
  0x2b   :  { %471 = vmatpush1.bf16.msra.mxu0 %v139_v50  ;;  %522 = vmatpush1.bf16.msra.mxu1 %v145_v51  ;;  %v2334_v50 = vpack.c.bf16 %v69_v45, %v68_v44 }
  0x2c   :  { %396 = vmatprep.mubr.bf16.mxu0 %v2171_v2  ;;  %447 = vmatprep.mubr.bf16.mxu1 %v2171_v2 }
  0x32   :  { %1925 = vmatmul.mubr.msk.bf16.gmra.mxu0 %vm94_vm1, %v67_v36  ;;  %1928 = vmatmul.mubr.msk.bf16.gmra.mxu1 %vm94_vm1, %v67_v36 }
  0x33   :  { %488 = vmatprep.mubr.bf16.mxu0 %v2171_v2  ;;  %539 = vmatprep.mubr.bf16.mxu1 %v2171_v2 }
  0x3a   :  { %1930 = vmatmul.mubr.msk.bf16.vlgmr.msra.gmra.mxu0 %vm94_vm1, %v2228_v24  ;;  %1933 = vmatmul.mubr.msk.bf16.vlgmr.msra.gmra.mxu1 %vm94_vm1, %v2228_v24 }
  0x3b   :  { %498 = vmatprep.mubr.bf16.mxu0 %v2171_v2  ;;  %549 = vmatprep.mubr.bf16.mxu1 %v2171_v2 }
  0x42   :  { %1931 = vmatmul.mubr.msk.bf16.gmra.mxu0 %vm94_vm1, %v67_v36  ;;  %1934 = vmatmul.mubr.msk.bf16.gmra.mxu1 %vm94_vm1, %v67_v36 }
  0x43   :  { %732 = vmatprep.mubr.bf16.mxu0 %v2171_v2  ;;  %775 = vmatprep.mubr.bf16.mxu1 %v2171_v2 }
  0x7f   :  { %v2306_v56 = vpop.permute.xlu0 %91 }
  0x80   :  { %v2308_v61 = vpop.permute.xlu1 %86 }
  0x84   :  { %v2310_v0 = vpop.permute.xlu0 %81 }
  0xca   :  { %v184_v52 = vpop.f32.mrf.mxu0  ;;  %v235_v53 = vpop.f32.mrf.mxu1 }
  0xcb   :  { %v185_v22 = vadd.f32 %v184_v52, %v2310_v0  ;;  %v236_v23 = vadd.f32 %v235_v53, %v2310_v0 }
  0xcc   :  { %v186_v54 = vpop.f32.mrf.mxu0  ;;  %v237_v55 = vpop.f32.mrf.mxu1 }
  0xcd   :  { %v187_v8 = vadd.f32 %v186_v54, %v2310_v0  ;;  %v238_v9 = vadd.f32 %v237_v55, %v2310_v0  ;;  %v558_v40 = vmax.f32 %v185_v22, 0.0  ;;  %v560_v41 = vmax.f32 %v236_v23, 0.0 }
  0xce   :  { %v188_v57 = vpop.f32.mrf.mxu0  ;;  %v239_v58 = vpop.f32.mrf.mxu1 }
  0xcf   :  { %v189_v12 = vadd.f32 %v188_v57, %v2308_v61  ;;  %v240_v13 = vadd.f32 %v239_v58, %v2308_v61  ;;  %v559_v28 = vmax.f32 %v187_v8, 0.0  ;;  %v561_v29 = vmax.f32 %v238_v9, 0.0 }
  0xd0   :  { %v190_v59 = vpop.f32.mrf.mxu0  ;;  %v241_v60 = vpop.f32.mrf.mxu1 }
  0xd1   :  { %v191_v1 = vadd.f32 %v190_v59, %v2308_v61  ;;  %v242_v3 = vadd.f32 %v241_v60, %v2308_v61  ;;  %v574_v32 = vmax.f32 %v189_v12, 0.0  ;;  %v576_v33 = vmax.f32 %v240_v13, 0.0 }
  0xd2   :  { %v194_v62 = vpop.f32.mrf.mxu0  ;;  %v245_v63 = vpop.f32.mrf.mxu1 }
  0xd3   :  { %v195_v4 = vadd.f32 %v194_v62, %v2306_v56  ;;  %v246_v5 = vadd.f32 %v245_v63, %v2306_v56  ;;  %v575_v18 = vmax.f32 %v191_v1, 0.0  ;;  %v577_v19 = vmax.f32 %v242_v3, 0.0 }
  0xd4   :  { %v196_v6 = vpop.f32.mrf.mxu0  ;;  %v247_v7 = vpop.f32.mrf.mxu1  ;;  %v606_v46 = vpack.c.bf16 %v574_v32, %v558_v40  ;;  %v608_v47 = vpack.c.bf16 %v576_v33, %v560_v41 }
  0xd5   :  { %v197_v10 = vadd.f32 %v196_v6, %v2306_v56  ;;  %v248_v11 = vadd.f32 %v247_v7, %v2306_v56  ;;  %v590_v14 = vmax.f32 %v195_v4, 0.0  ;;  %v592_v15 = vmax.f32 %v246_v5, 0.0 }
  0xd6   :  { %v198_v16 = vpop.f32.mrf.mxu0  ;;  %v249_v17 = vpop.f32.mrf.mxu1  ;;  %v607_v36 = vpack.c.bf16 %v575_v18, %v559_v28  ;;  %v609_v37 = vpack.c.bf16 %v577_v19, %v561_v29 }
  0xd7   :  { %v591_v20 = vmax.f32 %v197_v10, 0.0  ;;  %v593_v21 = vmax.f32 %v248_v11, 0.0  ;;  %v622_v24 = vpack.c.bf16 %v590_v14, %v590_v14  ;;  %v624_v25 = vpack.c.bf16 %v592_v15, %v592_v15 }
  0xd8   :  { %v199_v26 = vpop.f32.mrf.mxu0  ;;  %v250_v27 = vpop.f32.mrf.mxu1 }
  0xd9   :  { %v623_v30 = vpack.c.bf16 %v591_v20, %v591_v20  ;;  %v625_v31 = vpack.c.bf16 %v593_v21, %v593_v21  ;;  %v653_v38 = vsel %vm101_vm0, %v622_v24, 0  ;;  %v659_v39 = vsel %vm101_vm0, %v624_v25, 0 }
  0xda   :  { %v286_v34 = vpop.f32.mrf.mxu0  ;;  %v337_v35 = vpop.f32.mrf.mxu1 }
  0xdb   :  { %1935 = vmatprep.subr.msk.bf16.mxu0 %vm101_vm0, %v623_v30  ;;  %1937 = vmatprep.subr.msk.bf16.mxu1 %vm101_vm0, %v625_v31  ;;  %v287_v15 = vadd.f32 %v286_v34, %v2310_v0  ;;  %v338_v16 = vadd.f32 %v337_v35, %v2310_v0 }
  0xdc   :  { %v288_v42 = vpop.f32.mrf.mxu0  ;;  %v339_v43 = vpop.f32.mrf.mxu1  ;;  %713 = vmatpush1.bf16.msra.mxu0 %v653_v38  ;;  %756 = vmatpush1.bf16.msra.mxu1 %v659_v39 }
  0xdd   :  { %714 = vmatprep.subr.bf16.mxu0 %v607_v36  ;;  %757 = vmatprep.subr.bf16.mxu1 %v609_v37  ;;  %v289_v63 = vadd.f32 %v288_v42, %v2310_v0  ;;  %v340_v1 = vadd.f32 %v339_v43, %v2310_v0  ;;  %v562_v33 = vmax.f32 %v287_v15, 0.0  ;;  %v564_v34 = vmax.f32 %v338_v16, 0.0 }
  0xde   :  { %v290_v48 = vpop.f32.mrf.mxu0  ;;  %v341_v49 = vpop.f32.mrf.mxu1 }
  0xdf   :  { %v291_v5 = vadd.f32 %v290_v48, %v2308_v61  ;;  %v342_v6 = vadd.f32 %v341_v49, %v2308_v61  ;;  %v563_v21 = vmax.f32 %v289_v63, 0.0  ;;  %v565_v22 = vmax.f32 %v340_v1, 0.0 }
  0xe0   :  { %v292_v51 = vpop.f32.mrf.mxu0  ;;  %v343_v52 = vpop.f32.mrf.mxu1  ;;  %715 = vmatpush1.bf16.msra.mxu0 %v606_v46  ;;  %758 = vmatpush1.bf16.msra.mxu1 %v608_v47 }
  0xe1   :  { %v293_v55 = vadd.f32 %v292_v51, %v2308_v61  ;;  %v344_v57 = vadd.f32 %v343_v52, %v2308_v61  ;;  %v578_v25 = vmax.f32 %v291_v5, 0.0  ;;  %v580_v26 = vmax.f32 %v342_v6, 0.0 }
  0xe2   :  { %v296_v53 = vpop.f32.mrf.mxu0  ;;  %v347_v54 = vpop.f32.mrf.mxu1 }
  0xe3   :  { %1936 = vmatmul.mubr.msk.bf16.vlgmr.msra.gmra.mxu0 %vm648_vm2, %v2334_v50  ;;  %1938 = vmatmul.mubr.msk.bf16.vlgmr.msra.gmra.mxu1 %vm648_vm2, %v2334_v50  ;;  %v297_v58 = vadd.f32 %v296_v53, %v2306_v56  ;;  %v348_v59 = vadd.f32 %v347_v54, %v2306_v56  ;;  %v579_v11 = vmax.f32 %v293_v55, 0.0  ;;  %v581_v12 = vmax.f32 %v344_v57, 0.0 }
  0xe4   :  { %v298_v60 = vpop.f32.mrf.mxu0  ;;  %v349_v62 = vpop.f32.mrf.mxu1  ;;  %818 = vmatprep.mubr.bf16.mxu0 %v2171_v2  ;;  %861 = vmatprep.mubr.bf16.mxu1 %v2171_v2  ;;  %v610_v37 = vpack.c.bf16 %v578_v25, %v562_v33  ;;  %v612_v38 = vpack.c.bf16 %v580_v26, %v564_v34 }
  0xe5   :  { %v299_v3 = vadd.f32 %v298_v60, %v2306_v56  ;;  %v350_v4 = vadd.f32 %v349_v62, %v2306_v56  ;;  %v594_v7 = vmax.f32 %v297_v58, 0.0  ;;  %v596_v8 = vmax.f32 %v348_v59, 0.0 }
  0xe6   :  { %v300_v9 = vpop.f32.mrf.mxu0  ;;  %v351_v10 = vpop.f32.mrf.mxu1  ;;  %v611_v29 = vpack.c.bf16 %v579_v11, %v563_v21  ;;  %v613_v30 = vpack.c.bf16 %v581_v12, %v565_v22 }
  0xe7   :  { %v595_v13 = vmax.f32 %v299_v3, 0.0  ;;  %v597_v14 = vmax.f32 %v350_v4, 0.0  ;;  %v626_v17 = vpack.c.bf16 %v594_v7, %v594_v7  ;;  %v628_v18 = vpack.c.bf16 %v596_v8, %v596_v8 }
  0xe8   :  { %v301_v19 = vpop.f32.mrf.mxu0  ;;  %v352_v20 = vpop.f32.mrf.mxu1 }
  0xe9   :  { %v627_v23 = vpack.c.bf16 %v595_v13, %v595_v13  ;;  %v629_v24 = vpack.c.bf16 %v597_v14, %v597_v14  ;;  %v665_v31 = vsel %vm101_vm0, %v626_v17, 0  ;;  %v671_v32 = vsel %vm101_vm0, %v628_v18, 0 }
  0xea   :  { %v388_v27 = vpop.f32.mrf.mxu0  ;;  %v439_v28 = vpop.f32.mrf.mxu1 }
  0xeb   :  { %1939 = vmatprep.subr.msk.bf16.mxu0 %vm101_vm0, %v627_v23  ;;  %1941 = vmatprep.subr.msk.bf16.mxu1 %vm101_vm0, %v629_v24  ;;  %v389_v6 = vadd.f32 %v388_v27, %v2310_v0  ;;  %v440_v7 = vadd.f32 %v439_v28, %v2310_v0 }
  0xec   :  { %v390_v35 = vpop.f32.mrf.mxu0  ;;  %v441_v36 = vpop.f32.mrf.mxu1  ;;  %799 = vmatpush1.bf16.msra.mxu0 %v665_v31  ;;  %842 = vmatpush1.bf16.msra.mxu1 %v671_v32 }
  0xed   :  { %800 = vmatprep.subr.bf16.mxu0 %v611_v29  ;;  %843 = vmatprep.subr.bf16.mxu1 %v613_v30  ;;  %v391_v52 = vadd.f32 %v390_v35, %v2310_v0  ;;  %v442_v53 = vadd.f32 %v441_v36, %v2310_v0  ;;  %v566_v24 = vmax.f32 %v389_v6, 0.0  ;;  %v568_v25 = vmax.f32 %v440_v7, 0.0 }
  0xee   :  { %v392_v39 = vpop.f32.mrf.mxu0  ;;  %v443_v40 = vpop.f32.mrf.mxu1 }
  0xef   :  { %v393_v57 = vadd.f32 %v392_v39, %v2308_v61  ;;  %v444_v58 = vadd.f32 %v443_v40, %v2308_v61  ;;  %v567_v12 = vmax.f32 %v391_v52, 0.0  ;;  %v569_v13 = vmax.f32 %v442_v53, 0.0 }
  0xf0   :  { %v394_v41 = vpop.f32.mrf.mxu0  ;;  %v445_v42 = vpop.f32.mrf.mxu1  ;;  %801 = vmatpush1.bf16.msra.mxu0 %v610_v37  ;;  %844 = vmatpush1.bf16.msra.mxu1 %v612_v38 }
  0xf1   :  { %v395_v45 = vadd.f32 %v394_v41, %v2308_v61  ;;  %v446_v46 = vadd.f32 %v445_v42, %v2308_v61  ;;  %v582_v16 = vmax.f32 %v393_v57, 0.0  ;;  %v584_v17 = vmax.f32 %v444_v58, 0.0 }
  0xf2   :  { %v398_v43 = vpop.f32.mrf.mxu0  ;;  %v449_v44 = vpop.f32.mrf.mxu1 }
  0xf3   :  { %1940 = vmatmul.mubr.msk.bf16.vlgmr.msra.gmra.mxu0 %vm648_vm2, %v2334_v50  ;;  %1942 = vmatmul.mubr.msk.bf16.vlgmr.msra.gmra.mxu1 %vm648_vm2, %v2334_v50  ;;  %v399_v47 = vadd.f32 %v398_v43, %v2306_v56  ;;  %v450_v48 = vadd.f32 %v449_v44, %v2306_v56  ;;  %v583_v1 = vmax.f32 %v395_v45, 0.0  ;;  %v585_v3 = vmax.f32 %v446_v46, 0.0 }
  0xf4   :  { %v400_v49 = vpop.f32.mrf.mxu0  ;;  %v451_v51 = vpop.f32.mrf.mxu1  ;;  %904 = vmatprep.mubr.bf16.mxu0 %v2171_v2  ;;  %947 = vmatprep.mubr.bf16.mxu1 %v2171_v2  ;;  %v614_v28 = vpack.c.bf16 %v582_v16, %v566_v24  ;;  %v616_v29 = vpack.c.bf16 %v584_v17, %v568_v25 }
  0xf5   :  { %v401_v54 = vadd.f32 %v400_v49, %v2306_v56  ;;  %v452_v55 = vadd.f32 %v451_v51, %v2306_v56  ;;  %v598_v59 = vmax.f32 %v399_v47, 0.0  ;;  %v600_v60 = vmax.f32 %v450_v48, 0.0 }
  0xf6   :  { %v402_v62 = vpop.f32.mrf.mxu0  ;;  %v453_v63 = vpop.f32.mrf.mxu1  ;;  %v615_v20 = vpack.c.bf16 %v583_v1, %v567_v12  ;;  %v617_v21 = vpack.c.bf16 %v585_v3, %v569_v13 }
  0xf7   :  { %v599_v4 = vmax.f32 %v401_v54, 0.0  ;;  %v601_v5 = vmax.f32 %v452_v55, 0.0  ;;  %v630_v8 = vpack.c.bf16 %v598_v59, %v598_v59  ;;  %v632_v9 = vpack.c.bf16 %v600_v60, %v600_v60 }
  0xf8   :  { %v403_v10 = vpop.f32.mrf.mxu0  ;;  %v454_v11 = vpop.f32.mrf.mxu1 }
  0xf9   :  { %v631_v14 = vpack.c.bf16 %v599_v4, %v599_v4  ;;  %v633_v15 = vpack.c.bf16 %v601_v5, %v601_v5  ;;  %v677_v22 = vsel %vm101_vm0, %v630_v8, 0  ;;  %v683_v23 = vsel %vm101_vm0, %v632_v9, 0 }
  0xfa   :  { %v490_v18 = vpop.f32.mrf.mxu0  ;;  %v541_v19 = vpop.f32.mrf.mxu1 }
  0xfb   :  { %1943 = vmatprep.subr.msk.bf16.mxu0 %vm101_vm0, %v631_v14  ;;  %1945 = vmatprep.subr.msk.bf16.mxu1 %vm101_vm0, %v633_v15  ;;  %v491_v58 = vadd.f32 %v490_v18, %v2310_v0  ;;  %v542_v59 = vadd.f32 %v541_v19, %v2310_v0  ;;  %v2408_v14 = vpop.permute.xlu1 %640 }
  0xfc   :  { %v492_v26 = vpop.f32.mrf.mxu0  ;;  %v543_v27 = vpop.f32.mrf.mxu1  ;;  %885 = vmatpush1.bf16.msra.mxu0 %v677_v22  ;;  %928 = vmatpush1.bf16.msra.mxu1 %v683_v23 }
  0xfd   :  { %886 = vmatprep.subr.bf16.mxu0 %v615_v20  ;;  %929 = vmatprep.subr.bf16.mxu1 %v617_v21  ;;  %v493_v42 = vadd.f32 %v492_v26, %v2310_v0  ;;  %v544_v43 = vadd.f32 %v543_v27, %v2310_v0  ;;  %v570_v10 = vmax.f32 %v491_v58, 0.0  ;;  %v572_v11 = vmax.f32 %v542_v59, 0.0  ;;  %v2414_v26 = vpop.permute.xlu0 %645 }
  0xfe   :  { %v494_v30 = vpop.f32.mrf.mxu0  ;;  %v545_v31 = vpop.f32.mrf.mxu1 }
  0xff   :  { %v495_v46 = vadd.f32 %v494_v30, %v2308_v61  ;;  %v546_v47 = vadd.f32 %v545_v31, %v2308_v61  ;;  %v571_v1 = vmax.f32 %v493_v42, 0.0  ;;  %v573_v3 = vmax.f32 %v544_v43, 0.0 }
 0x100   :  { %v496_v32 = vpop.f32.mrf.mxu0  ;;  %v547_v33 = vpop.f32.mrf.mxu1  ;;  %887 = vmatpush1.bf16.msra.mxu0 %v614_v28  ;;  %930 = vmatpush1.bf16.msra.mxu1 %v616_v29 }
 0x101   :  { %v497_v36 = vadd.f32 %v496_v32, %v2308_v61  ;;  %v548_v37 = vadd.f32 %v547_v33, %v2308_v61  ;;  %v586_v5 = vmax.f32 %v495_v46, 0.0  ;;  %v588_v6 = vmax.f32 %v546_v47, 0.0 }
 0x102   :  { %v500_v34 = vpop.f32.mrf.mxu0  ;;  %v551_v35 = vpop.f32.mrf.mxu1 }
 0x103   :  { %1944 = vmatmul.mubr.msk.bf16.vlgmr.msra.gmra.mxu0 %vm648_vm2, %v2334_v50  ;;  %1946 = vmatmul.mubr.msk.bf16.vlgmr.msra.gmra.mxu1 %vm648_vm2, %v2334_v50  ;;  %v501_v38 = vadd.f32 %v500_v34, %v2306_v56  ;;  %v552_v39 = vadd.f32 %v551_v35, %v2306_v56  ;;  %v587_v53 = vmax.f32 %v497_v36, 0.0  ;;  %v589_v54 = vmax.f32 %v548_v37, 0.0 }
 0x104   :  { %v502_v40 = vpop.f32.mrf.mxu0  ;;  %v553_v41 = vpop.f32.mrf.mxu1  ;;  %990 = vmatprep.mubr.bf16.mxu0 %v2171_v2  ;;  %1033 = vmatprep.mubr.bf16.mxu1 %v2171_v2  ;;  %v618_v12 = vpack.c.bf16 %v586_v5, %v570_v10  ;;  %v620_v13 = vpack.c.bf16 %v588_v6, %v572_v11 }
 0x105   :  { %v503_v44 = vadd.f32 %v502_v40, %v2306_v56  ;;  %v554_v45 = vadd.f32 %v553_v41, %v2306_v56  ;;  %v602_v48 = vmax.f32 %v501_v38, 0.0  ;;  %v604_v49 = vmax.f32 %v552_v39, 0.0 }
 0x106   :  { %v504_v51 = vpop.f32.mrf.mxu0  ;;  %v555_v52 = vpop.f32.mrf.mxu1  ;;  %v619_v7 = vpack.c.bf16 %v587_v53, %v571_v1  ;;  %v621_v8 = vpack.c.bf16 %v589_v54, %v573_v3 }
 0x107   :  { %v603_v55 = vmax.f32 %v503_v44, 0.0  ;;  %v605_v57 = vmax.f32 %v554_v45, 0.0  ;;  %v634_v60 = vpack.c.bf16 %v602_v48, %v602_v48  ;;  %v636_v62 = vpack.c.bf16 %v604_v49, %v604_v49 }
 0x108   :  { %v505_v63 = vpop.f32.mrf.mxu0  ;;  %v556_v56 = vpop.f32.mrf.mxu1 }
 0x109   :  { %v635_v4 = vpack.c.bf16 %v603_v55, %v603_v55  ;;  %v637_v61 = vpack.c.bf16 %v605_v57, %v605_v57  ;;  %v689_v9 = vsel %vm101_vm0, %v634_v60, 0  ;;  %v695_v0 = vsel %vm101_vm0, %v636_v62, 0 }
 0x10b   :  { %1947 = vmatprep.subr.msk.bf16.mxu0 %vm101_vm0, %v635_v4  ;;  %1949 = vmatprep.subr.msk.bf16.mxu1 %vm101_vm0, %v637_v61 }
 0x10c   :  { %971 = vmatpush1.bf16.msra.mxu0 %v689_v9  ;;  %1014 = vmatpush1.bf16.msra.mxu1 %v695_v0 }
 0x10d   :  { %972 = vmatprep.subr.bf16.mxu0 %v619_v7  ;;  %1015 = vmatprep.subr.bf16.mxu1 %v621_v8 }
 0x110   :  { %973 = vmatpush1.bf16.msra.mxu0 %v618_v12  ;;  %1016 = vmatpush1.bf16.msra.mxu1 %v620_v13 }
 0x113   :  { %1948 = vmatmul.mubr.msk.bf16.vlgmr.msra.gmra.mxu0 %vm648_vm2, %v2334_v50  ;;  %1950 = vmatmul.mubr.msk.bf16.vlgmr.msra.gmra.mxu1 %vm648_vm2, %v2334_v50 }
 0x114   :  { %1310 = vmatprep.mubr.bf16.mxu0 %v2171_v2  ;;  %1351 = vmatprep.mubr.bf16.mxu1 %v2171_v2 }
 0x1a3   :  { %v734_v15 = vpop.f32.mrf.mxu0  ;;  %v777_v16 = vpop.f32.mrf.mxu1 }
 0x1a4   :  { %v735_v17 = vadd.f32 %v734_v15, %v2408_v14  ;;  %v778_v18 = vadd.f32 %v777_v16, %v2408_v14 }
 0x1a5   :  { %v736_v19 = vpop.f32.mrf.mxu0  ;;  %v779_v20 = vpop.f32.mrf.mxu1 }
 0x1a6   :  { %v1044_v21 = vsub.f32 0.0, %v735_v17  ;;  %v1046_v22 = vsub.f32 0.0, %v778_v18  ;;  %v737_v23 = vadd.f32 %v736_v19, %v2408_v14  ;;  %v780_v50 = vadd.f32 %v779_v20, %v2408_v14 }
 0x1a7   :  { %v738_v24 = vpop.f32.mrf.mxu0  ;;  %v781_v25 = vpop.f32.mrf.mxu1 }
 0x1a8   :  { %v1076_v27 = vmul.f32 1.442695, %v1044_v21  ;;  %v1080_v28 = vmul.f32 1.442695, %v1046_v22  ;;  %v1045_v29 = vsub.f32 0.0, %v737_v23  ;;  %v1047_v30 = vsub.f32 0.0, %v780_v50 }
 0x1a9   :  { %v739_v31 = vadd.f32 %v738_v24, %v2414_v26  ;;  %v782_v32 = vadd.f32 %v781_v25, %v2414_v26  ;;  %v740_v33 = vpop.f32.mrf.mxu0  ;;  %v783_v34 = vpop.f32.mrf.mxu1 }
 0x1aa   :  { %1979 = vpow2.f32 %v1076_v27  ;;  %v1078_v35 = vmul.f32 1.442695, %v1045_v29  ;;  %v1082_v36 = vmul.f32 1.442695, %v1047_v30  ;;  %v741_v37 = vadd.f32 %v740_v33, %v2414_v26 }
 0x1ab   :  { %1981 = vpow2.f32 %v1080_v28  ;;  %v1060_v38 = vsub.f32 0.0, %v739_v31  ;;  %v1062_v39 = vsub.f32 0.0, %v782_v32  ;;  %v784_v40 = vadd.f32 %v783_v34, %v2414_v26 }
 0x1ac   :  { %1983 = vpow2.f32 %v1078_v35  ;;  %v1061_v41 = vsub.f32 0.0, %v741_v37 }
 0x1ad   :  { %1985 = vpow2.f32 %v1082_v36  ;;  %v1108_v42 = vmul.f32 1.442695, %v1060_v38  ;;  %v1112_v43 = vmul.f32 1.442695, %v1062_v39  ;;  %v1063_v44 = vsub.f32 0.0, %v784_v40 }
 0x1ae   :  { %v1110_v45 = vmul.f32 1.442695, %v1061_v41 }
 0x1af   :  { %1987 = vpow2.f32 %v1108_v42  ;;  %v1114_v46 = vmul.f32 1.442695, %v1063_v44 }
 0x1b0   :  { %1989 = vpow2.f32 %v1112_v43 }
 0x1b1   :  { %1991 = vpow2.f32 %v1110_v45 }
 0x1b2   :  { %1993 = vpow2.f32 %v1114_v46 }
 0x1b3   :  { %v820_v47 = vpop.f32.mrf.mxu0  ;;  %v863_v48 = vpop.f32.mrf.mxu1 }
 0x1b4   :  { %v821_v49 = vadd.f32 %v820_v47, %v2408_v14  ;;  %v864_v55 = vadd.f32 %v863_v48, %v2408_v14 }
 0x1b5   :  { %v822_v51 = vpop.f32.mrf.mxu0  ;;  %v865_v52 = vpop.f32.mrf.mxu1 }
 0x1b6   :  { %v1048_v53 = vsub.f32 0.0, %v821_v49  ;;  %v823_v62 = vadd.f32 %v822_v51, %v2408_v14  ;;  %v866_v1 = vadd.f32 %v865_v52, %v2408_v14  ;;  %v1050_v9 = vsub.f32 0.0, %v864_v55 }
 0x1b7   :  { %v1980_v54 = vpop.eup %1979  ;;  %v824_v57 = vpop.f32.mrf.mxu0 }
 0x1b8   :  { %v867_v58 = vpop.f32.mrf.mxu1  ;;  %v1982_v59 = vpop.eup %1981  ;;  %v1140_v60 = vadd.f32 1.0, %v1980_v54  ;;  %v1084_v5 = vmul.f32 1.442695, %v1048_v53  ;;  %v825_v6 = vadd.f32 %v824_v57, %v2414_v26  ;;  %v1049_v11 = vsub.f32 0.0, %v823_v62 }
 0x1b9   :  { %v1984_v63 = vpop.eup %1983  ;;  %v1142_v56 = vadd.f32 1.0, %v1982_v59  ;;  %v826_v3 = vpop.f32.mrf.mxu0  ;;  %v868_v0 = vadd.f32 %v867_v58, %v2414_v26  ;;  %v1051_v16 = vsub.f32 0.0, %v866_v1  ;;  %v1088_v23 = vmul.f32 1.442695, %v1050_v9 }
 0x1ba   :  { %v1986_v4 = vpop.eup %1985  ;;  %1995 = vrcp.f32 %v1140_v60  ;;  %v1141_v61 = vadd.f32 1.0, %v1984_v63  ;;  %v869_v7 = vpop.f32.mrf.mxu1  ;;  %v827_v12 = vadd.f32 %v826_v3, %v2414_v26  ;;  %v1064_v20 = vsub.f32 0.0, %v825_v6 }
 0x1bb   :  { %1997 = vrcp.f32 %v1142_v56  ;;  %v1143_v8 = vadd.f32 1.0, %v1986_v4  ;;  %v870_v17 = vadd.f32 %v869_v7, %v2414_v26  ;;  %v1066_v50 = vsub.f32 0.0, %v868_v0 }
 0x1bc   :  { %v1988_v10 = vpop.eup %1987  ;;  %1999 = vrcp.f32 %v1141_v61  ;;  %v1086_v25 = vmul.f32 1.442695, %v1049_v11  ;;  %v1065_v27 = vsub.f32 0.0, %v827_v12  ;;  %v1090_v28 = vmul.f32 1.442695, %v1051_v16 }
 0x1bd   :  { %v1990_v13 = vpop.eup %1989  ;;  %2001 = vrcp.f32 %v1143_v8  ;;  %v1156_v15 = vadd.f32 1.0, %v1988_v10  ;;  %v1067_v29 = vsub.f32 0.0, %v870_v17  ;;  %v1116_v30 = vmul.f32 1.442695, %v1064_v20  ;;  %v71_v16 = vld [vmem:[%s2544_s1 + $0x28] sm:$0x3] }
 0x1be   :  { %v1992_v18 = vpop.eup %1991  ;;  %v1158_v19 = vadd.f32 1.0, %v1990_v13  ;;  %2003 = vpow2.f32 %v1084_v5  ;;  %v1120_v31 = vmul.f32 1.442695, %v1066_v50  ;;  %v1118_v34 = vmul.f32 1.442695, %v1065_v27 }
 0x1bf   :  { %v1994_v21 = vpop.eup %1993  ;;  %2005 = vrcp.f32 %v1156_v15  ;;  %v1157_v22 = vadd.f32 1.0, %v1992_v18  ;;  %v1122_v37 = vmul.f32 1.442695, %v1067_v29  ;;  %v2441_v50 = vpack.c.bf16 %v71_v16, %v71_v16 }
 0x1c0   :  { %2007 = vrcp.f32 %v1158_v19  ;;  %v1159_v24 = vadd.f32 1.0, %v1994_v21 }
 0x1c1   :  { %2009 = vrcp.f32 %v1157_v22 }
 0x1c2   :  { %2011 = vrcp.f32 %v1159_v24 }
 0x1c3   :  { %2013 = vpow2.f32 %v1088_v23  ;;  %v906_v32 = vpop.f32.mrf.mxu0  ;;  %v949_v33 = vpop.f32.mrf.mxu1 }
 0x1c4   :  { %2015 = vpow2.f32 %v1086_v25  ;;  %v907_v35 = vadd.f32 %v906_v32, %v2408_v14  ;;  %v950_v36 = vadd.f32 %v949_v33, %v2408_v14 }
 0x1c5   :  { %2017 = vpow2.f32 %v1090_v28  ;;  %v908_v38 = vpop.f32.mrf.mxu0  ;;  %v951_v39 = vpop.f32.mrf.mxu1 }
 0x1c6   :  { %2019 = vpow2.f32 %v1116_v30  ;;  %v1052_v40 = vsub.f32 0.0, %v907_v35  ;;  %v1054_v41 = vsub.f32 0.0, %v950_v36  ;;  %v909_v42 = vadd.f32 %v908_v38, %v2408_v14 }
 0x1c7   :  { %v1996_v43 = vpop.eup %1995  ;;  %2021 = vpow2.f32 %v1120_v31  ;;  %v952_v44 = vadd.f32 %v951_v39, %v2408_v14  ;;  %v910_v45 = vpop.f32.mrf.mxu0 }
 0x1c8   :  { %v953_v46 = vpop.f32.mrf.mxu1  ;;  %v1998_v47 = vpop.eup %1997  ;;  %2023 = vpow2.f32 %v1118_v34  ;;  %v1092_v48 = vmul.f32 1.442695, %v1052_v40  ;;  %v1096_v49 = vmul.f32 1.442695, %v1054_v41  ;;  %v1053_v51 = vsub.f32 0.0, %v909_v42 }
 0x1c9   :  { %v2000_v52 = vpop.eup %1999  ;;  %2025 = vpow2.f32 %v1122_v37  ;;  %v1055_v53 = vsub.f32 0.0, %v952_v44  ;;  %v911_v54 = vadd.f32 %v910_v45, %v2414_v26  ;;  %v954_v55 = vadd.f32 %v953_v46, %v2414_v26  ;;  %v912_v57 = vpop.f32.mrf.mxu0 }
 0x1ca   :  { %v955_v58 = vpop.f32.mrf.mxu1  ;;  %v2002_v59 = vpop.eup %2001  ;;  %2027 = vpow2.f32 %v1092_v48  ;;  %v1094_v60 = vmul.f32 1.442695, %v1053_v51  ;;  %v913_v62 = vadd.f32 %v912_v57, %v2414_v26 }
 0x1cb   :  { %v956_v63 = vadd.f32 %v955_v58, %v2414_v26  ;;  %v2004_v56 = vpop.eup %2003  ;;  %2029 = vpow2.f32 %v1096_v49  ;;  %v1098_v1 = vmul.f32 1.442695, %v1055_v53  ;;  %v1068_v3 = vsub.f32 0.0, %v911_v54 }
 0x1cc   :  { %v1070_v4 = vsub.f32 0.0, %v954_v55  ;;  %v2006_v61 = vpop.eup %2005  ;;  %v1144_v5 = vadd.f32 1.0, %v2004_v56  ;;  %2031 = vpow2.f32 %v1094_v60  ;;  %v1069_v6 = vsub.f32 0.0, %v913_v62 }
 0x1cd   :  { %v1071_v7 = vsub.f32 0.0, %v956_v63  ;;  %v2008_v8 = vpop.eup %2007  ;;  %2033 = vpow2.f32 %v1098_v1  ;;  %v1124_v9 = vmul.f32 1.442695, %v1068_v3  ;;  %v1204_v10 = vpack.c.bf16 %v2006_v61, %v1996_v43 }
 0x1ce   :  { %v1128_v0 = vmul.f32 1.442695, %v1070_v4  ;;  %v2010_v11 = vpop.eup %2009  ;;  %2035 = vrcp.f32 %v1144_v5  ;;  %v1126_v12 = vmul.f32 1.442695, %v1069_v6  ;;  %v1206_v15 = vpack.c.bf16 %v2008_v8, %v1998_v47 }
 0x1cf   :  { %v1130_v13 = vmul.f32 1.442695, %v1071_v7  ;;  %v2012_v17 = vpop.eup %2011  ;;  %2037 = vpow2.f32 %v1124_v9  ;;  %v1205_v18 = vpack.c.bf16 %v2010_v11, %v2000_v52  ;;  %v1231_v23 = vsel %vm1229_vm3, %v1204_v10, 0 }
 0x1d0   :  { %v2014_v19 = vpop.eup %2013  ;;  %2039 = vpow2.f32 %v1128_v0  ;;  %v1207_v20 = vpack.c.bf16 %v2012_v17, %v2002_v59  ;;  %v1237_v27 = vsel %vm1229_vm3, %v1206_v15, 0 }
 0x1d1   :  { %v2016_v21 = vpop.eup %2015  ;;  %v1146_v22 = vadd.f32 1.0, %v2014_v19  ;;  %2041 = vpow2.f32 %v1126_v12  ;;  %1951 = vmatprep.subr.msk.bf16.mxu0 %vm1229_vm3, %v1205_v18 }
 0x1d2   :  { %v2018_v24 = vpop.eup %2017  ;;  %v1145_v25 = vadd.f32 1.0, %v2016_v21  ;;  %2043 = vpow2.f32 %v1130_v13  ;;  %1953 = vmatprep.subr.msk.bf16.mxu1 %vm1229_vm3, %v1207_v20  ;;  %1293 = vmatpush1.bf16.msra.mxu0 %v1231_v23 }
 0x1d3   :  { %v2020_v28 = vpop.eup %2019  ;;  %2045 = vrcp.f32 %v1146_v22  ;;  %v1147_v29 = vadd.f32 1.0, %v2018_v24  ;;  %1334 = vmatpush1.bf16.msra.mxu1 %v1237_v27  ;;  %v992_v30 = vpop.f32.mrf.mxu0 }
 0x1d4   :  { %v1035_v31 = vpop.f32.mrf.mxu1  ;;  %v2022_v32 = vpop.eup %2021  ;;  %2047 = vrcp.f32 %v1145_v25  ;;  %v1160_v33 = vadd.f32 1.0, %v2020_v28  ;;  %v993_v34 = vadd.f32 %v992_v30, %v2408_v14 }
 0x1d5   :  { %v2024_v35 = vpop.eup %2023  ;;  %2049 = vrcp.f32 %v1147_v29  ;;  %v1162_v36 = vadd.f32 1.0, %v2022_v32  ;;  %1952 = vmatmul.mubr.msk.bf16.vlgmr.msra.gmra.mxu0 %vm1225_vm4, %v2441_v50  ;;  %v994_v37 = vpop.f32.mrf.mxu0  ;;  %v1036_v44 = vadd.f32 %v1035_v31, %v2408_v14 }
 0x1d6   :  { %v1037_v38 = vpop.f32.mrf.mxu1  ;;  %v2026_v39 = vpop.eup %2025  ;;  %2051 = vrcp.f32 %v1160_v33  ;;  %v1161_v40 = vadd.f32 1.0, %v2024_v35  ;;  %v1056_v41 = vsub.f32 0.0, %v993_v34  ;;  %1954 = vmatmul.mubr.msk.bf16.vlgmr.msra.gmra.mxu1 %vm1225_vm4, %v2441_v50  ;;  %1392 = vmatprep.mubr.bf16.mxu0 %v2171_v2  ;;  %v995_v49 = vadd.f32 %v994_v37, %v2408_v14 }
 0x1d7   :  { %v2028_v42 = vpop.eup %2027  ;;  %2053 = vrcp.f32 %v1162_v36  ;;  %v1163_v43 = vadd.f32 1.0, %v2026_v39  ;;  %v996_v45 = vpop.f32.mrf.mxu0  ;;  %1433 = vmatprep.mubr.bf16.mxu1 %v2171_v2  ;;  %v1038_v53 = vadd.f32 %v1037_v38, %v2408_v14  ;;  %v1058_v56 = vsub.f32 0.0, %v1036_v44 }
 0x1d8   :  { %v1039_v46 = vpop.f32.mrf.mxu1  ;;  %v2030_v47 = vpop.eup %2029  ;;  %2055 = vrcp.f32 %v1161_v40  ;;  %v1148_v48 = vadd.f32 1.0, %v2028_v42  ;;  %v1100_v58 = vmul.f32 1.442695, %v1056_v41  ;;  %v997_v59 = vadd.f32 %v996_v45, %v2414_v26 }
 0x1d9   :  { %v2032_v51 = vpop.eup %2031  ;;  %2057 = vrcp.f32 %v1163_v43  ;;  %v1150_v52 = vadd.f32 1.0, %v2030_v47  ;;  %v998_v54 = vpop.f32.mrf.mxu0  ;;  %v1040_v1 = vadd.f32 %v1039_v46, %v2414_v26  ;;  %v1057_v4 = vsub.f32 0.0, %v995_v49 }
 0x1da   :  { %v2034_v55 = vpop.eup %2033  ;;  %2059 = vrcp.f32 %v1148_v48  ;;  %v1149_v57 = vadd.f32 1.0, %v2032_v51  ;;  %v1041_v60 = vpop.f32.mrf.mxu1  ;;  %v999_v61 = vadd.f32 %v998_v54, %v2414_v26  ;;  %v1059_v6 = vsub.f32 0.0, %v1038_v53 }
 0x1db   :  { %v2036_v62 = vpop.eup %2035  ;;  %2061 = vrcp.f32 %v1150_v52  ;;  %v1151_v63 = vadd.f32 1.0, %v2034_v55  ;;  %v1042_v7 = vadd.f32 %v1041_v60, %v2414_v26  ;;  %v1072_v0 = vsub.f32 0.0, %v997_v59 }
 0x1dc   :  { %v2038_v3 = vpop.eup %2037  ;;  %2063 = vrcp.f32 %v1149_v57  ;;  %v1104_v12 = vmul.f32 1.442695, %v1058_v56  ;;  %v1074_v13 = vsub.f32 0.0, %v1040_v1  ;;  %v1102_v17 = vmul.f32 1.442695, %v1057_v4 }
 0x1dd   :  { %v2040_v14 = vpop.eup %2039  ;;  %2065 = vrcp.f32 %v1151_v63  ;;  %v1164_v5 = vadd.f32 1.0, %v2038_v3  ;;  %v1073_v18 = vsub.f32 0.0, %v999_v61  ;;  %v1106_v20 = vmul.f32 1.442695, %v1059_v6 }
 0x1de   :  { %v2042_v8 = vpop.eup %2041  ;;  %v1166_v9 = vadd.f32 1.0, %v2040_v14  ;;  %2067 = vpow2.f32 %v1100_v58  ;;  %v1075_v21 = vsub.f32 0.0, %v1042_v7  ;;  %v1132_v26 = vmul.f32 1.442695, %v1072_v0 }
 0x1df   :  { %v2044_v10 = vpop.eup %2043  ;;  %2069 = vrcp.f32 %v1164_v5  ;;  %v1165_v11 = vadd.f32 1.0, %v2042_v8  ;;  %v1136_v24 = vmul.f32 1.442695, %v1074_v13  ;;  %v1134_v27 = vmul.f32 1.442695, %v1073_v18  ;;  %v2487_v18 = vpop.permute.xlu1 %1222 }
 0x1e0   :  { %v2046_v15 = vpop.eup %2045  ;;  %2071 = vrcp.f32 %v1166_v9  ;;  %v1167_v16 = vadd.f32 1.0, %v2044_v10  ;;  %v1138_v30 = vmul.f32 1.442695, %v1075_v21 }
 0x1e1   :  { %v2048_v19 = vpop.eup %2047  ;;  %2073 = vrcp.f32 %v1165_v11 }
 0x1e2   :  { %v2050_v22 = vpop.eup %2049  ;;  %2075 = vrcp.f32 %v1167_v16 }
 0x1e3   :  { %v2052_v23 = vpop.eup %2051  ;;  %2077 = vpow2.f32 %v1104_v12 }
 0x1e4   :  { %v2054_v25 = vpop.eup %2053  ;;  %2079 = vpow2.f32 %v1102_v17  ;;  %v1208_v28 = vpack.c.bf16 %v2052_v23, %v2036_v62 }
 0x1e5   :  { %v2056_v29 = vpop.eup %2055  ;;  %2081 = vpow2.f32 %v1106_v20  ;;  %v1210_v31 = vpack.c.bf16 %v2054_v25, %v2046_v15 }
 0x1e6   :  { %v2058_v32 = vpop.eup %2057  ;;  %2083 = vpow2.f32 %v1132_v26  ;;  %v1209_v33 = vpack.c.bf16 %v2056_v29, %v2048_v19  ;;  %v1243_v37 = vsel %vm1229_vm3, %v1208_v28, 0 }
 0x1e7   :  { %v2060_v34 = vpop.eup %2059  ;;  %2085 = vpow2.f32 %v1136_v24  ;;  %v1211_v35 = vpack.c.bf16 %v2058_v32, %v2050_v22  ;;  %v1249_v39 = vsel %vm1229_vm3, %v1210_v31, 0 }
 0x1e8   :  { %v2062_v36 = vpop.eup %2061  ;;  %2087 = vpow2.f32 %v1134_v27  ;;  %1955 = vmatprep.subr.msk.bf16.mxu0 %vm1229_vm3, %v1209_v33 }
 0x1e9   :  { %v2064_v38 = vpop.eup %2063  ;;  %2089 = vpow2.f32 %v1138_v30  ;;  %1957 = vmatprep.subr.msk.bf16.mxu1 %vm1229_vm3, %v1211_v35  ;;  %1375 = vmatpush1.bf16.msra.mxu0 %v1243_v37 }
 0x1ea   :  { %v2066_v40 = vpop.eup %2065  ;;  %1416 = vmatpush1.bf16.msra.mxu1 %v1249_v39 }
 0x1eb   :  { %v2068_v41 = vpop.eup %2067 }
 0x1ec   :  { %v2070_v42 = vpop.eup %2069  ;;  %1956 = vmatmul.mubr.msk.bf16.vlgmr.msra.gmra.mxu0 %vm1225_vm4, %v2441_v50  ;;  %v1152_v46 = vadd.f32 1.0, %v2068_v41 }
 0x1ed   :  { %v2072_v43 = vpop.eup %2071  ;;  %1958 = vmatmul.mubr.msk.bf16.vlgmr.msra.gmra.mxu1 %vm1225_vm4, %v2441_v50  ;;  %v1212_v44 = vpack.c.bf16 %v2070_v42, %v2060_v34  ;;  %1474 = vmatprep.mubr.bf16.mxu0 %v2171_v2 }
 0x1ee   :  { %v2074_v45 = vpop.eup %2073  ;;  %v1214_v47 = vpack.c.bf16 %v2072_v43, %v2062_v36  ;;  %1515 = vmatprep.mubr.bf16.mxu1 %v2171_v2  ;;  %2091 = vrcp.f32 %v1152_v46 }
 0x1ef   :  { %v2076_v48 = vpop.eup %2075  ;;  %v1213_v49 = vpack.c.bf16 %v2074_v45, %v2064_v38  ;;  %v1255_v55 = vsel %vm1229_vm3, %v1212_v44, 0 }
 0x1f0   :  { %v2078_v51 = vpop.eup %2077  ;;  %v1215_v52 = vpack.c.bf16 %v2076_v48, %v2066_v40  ;;  %v1261_v59 = vsel %vm1229_vm3, %v1214_v47, 0 }
 0x1f1   :  { %v2080_v53 = vpop.eup %2079  ;;  %v1154_v54 = vadd.f32 1.0, %v2078_v51  ;;  %1959 = vmatprep.subr.msk.bf16.mxu0 %vm1229_vm3, %v1213_v49 }
 0x1f2   :  { %v2082_v57 = vpop.eup %2081  ;;  %v1153_v58 = vadd.f32 1.0, %v2080_v53  ;;  %1961 = vmatprep.subr.msk.bf16.mxu1 %vm1229_vm3, %v1215_v52  ;;  %1457 = vmatpush1.bf16.msra.mxu0 %v1255_v55 }
 0x1f3   :  { %v2084_v60 = vpop.eup %2083  ;;  %2093 = vrcp.f32 %v1154_v54  ;;  %v1155_v62 = vadd.f32 1.0, %v2082_v57  ;;  %1498 = vmatpush1.bf16.msra.mxu1 %v1261_v59 }
 0x1f4   :  { %v2086_v63 = vpop.eup %2085  ;;  %2095 = vrcp.f32 %v1153_v58  ;;  %v1168_v56 = vadd.f32 1.0, %v2084_v60 }
 0x1f5   :  { %v2088_v1 = vpop.eup %2087  ;;  %2097 = vrcp.f32 %v1155_v62  ;;  %v1170_v3 = vadd.f32 1.0, %v2086_v63  ;;  %1960 = vmatmul.mubr.msk.bf16.vlgmr.msra.gmra.mxu0 %vm1225_vm4, %v2441_v50 }
 0x1f6   :  { %v2090_v4 = vpop.eup %2089  ;;  %2099 = vrcp.f32 %v1168_v56  ;;  %v1169_v61 = vadd.f32 1.0, %v2088_v1  ;;  %1962 = vmatmul.mubr.msk.bf16.vlgmr.msra.gmra.mxu1 %vm1225_vm4, %v2441_v50  ;;  %1556 = vmatprep.mubr.bf16.mxu0 %v2171_v2 }
 0x1f7   :  { %2101 = vrcp.f32 %v1170_v3  ;;  %v1171_v14 = vadd.f32 1.0, %v2090_v4  ;;  %1597 = vmatprep.mubr.bf16.mxu1 %v2171_v2 }
 0x1f8   :  { %2103 = vrcp.f32 %v1169_v61 }
 0x1f9   :  { %2105 = vrcp.f32 %v1171_v14 }
 0x1fb   :  { %v2092_v5 = vpop.eup %2091 }
 0x200   :  { %v2094_v6 = vpop.eup %2093 }
 0x201   :  { %v2096_v7 = vpop.eup %2095 }
 0x202   :  { %v2098_v8 = vpop.eup %2097 }
 0x203   :  { %v2100_v9 = vpop.eup %2099 }
 0x204   :  { %v2102_v0 = vpop.eup %2101  ;;  %v1216_v10 = vpack.c.bf16 %v2100_v9, %v2092_v5 }
 0x205   :  { %v2104_v11 = vpop.eup %2103  ;;  %v1218_v12 = vpack.c.bf16 %v2102_v0, %v2094_v6 }
 0x206   :  { %v2106_v13 = vpop.eup %2105  ;;  %v1217_v15 = vpack.c.bf16 %v2104_v11, %v2096_v7  ;;  %v1267_v17 = vsel %vm1229_vm3, %v1216_v10, 0 }
 0x207   :  { %v1219_v16 = vpack.c.bf16 %v2106_v13, %v2098_v8  ;;  %v1273_v2 = vsel %vm1229_vm3, %v1218_v12, 0 }
 0x208   :  { %1963 = vmatprep.subr.msk.bf16.mxu0 %vm1229_vm3, %v1217_v15  ;;  %v2172_v15 = vmov 1983009808  }
 0x209   :  { %1965 = vmatprep.subr.msk.bf16.mxu1 %vm1229_vm3, %v1219_v16  ;;  %1539 = vmatpush1.bf16.msra.mxu0 %v1267_v17  ;;  %v1834_v16 = vunpack.c.l.s4 %v2172_v15  ;;  %v1836_v17 = vlaneseq }
 0x20a   :  { %1580 = vmatpush1.bf16.msra.mxu1 %v1273_v2 }
 0x20c   :  { %1964 = vmatmul.mubr.msk.bf16.vlgmr.msra.gmra.mxu0 %vm1225_vm4, %v2441_v50 }
 0x20d   :  { %1966 = vmatmul.mubr.msk.bf16.vlgmr.msra.gmra.mxu1 %vm1225_vm4, %v2441_v50 }
 0x295   :  { %v1312_v19 = vpop.f32.mrf.mxu0 }
 0x296   :  { %v1313_v20 = vadd.f32 %v1312_v19, %v2487_v18  ;;  %v1353_v21 = vpop.f32.mrf.mxu1 }
 0x297   :  { %v1354_v22 = vadd.f32 %v1353_v21, %v2487_v18  ;;  %v1314_v26 = vpop.f32.mrf.mxu0 }
 0x298   :  { %v1622_v23 = vrot.slane %v1313_v20, 7  ;;  %v1315_v24 = vadd.f32 %v1314_v26, %v2487_v18  ;;  %v1355_v25 = vpop.f32.mrf.mxu1 }
 0x299   :  { %v1624_v27 = vrot.slane %v1354_v22, 7  ;;  %v1356_v28 = vadd.f32 %v1355_v25, %v2487_v18  ;;  %v1316_v29 = vpop.f32.mrf.mxu0 }
 0x29a   :  { %v1654_v30 = vsub.f32 %v1313_v20, %v1622_v23  ;;  %v1623_v31 = vrot.slane %v1315_v24, 7  ;;  %v1357_v50 = vpop.f32.mrf.mxu1 }
 0x29b   :  { %v1656_v32 = vsub.f32 %v1354_v22, %v1624_v27  ;;  %v1625_v33 = vrot.slane %v1356_v28, 7  ;;  %v1317_v34 = vpop.f32.mrf.mxu0 }
 0x29c   :  { %v1670_v35 = vmul.f32 1.442695, %v1654_v30  ;;  %v1655_v36 = vsub.f32 %v1315_v24, %v1623_v31  ;;  %v1358_v37 = vpop.f32.mrf.mxu1  ;;  %v1835_v30 = vunpack.c.0.s8 %v1834_v16  ;;  %v1837_v31 = vshrl.u32 %v1836_v17, 7 }
 0x29d   :  { %v1674_v38 = vmul.f32 1.442695, %v1656_v32  ;;  %v1657_v39 = vsub.f32 %v1356_v28, %v1625_v33 }
 0x29e   :  { %2107 = vpow2.f32 %v1670_v35  ;;  %v1672_v40 = vmul.f32 1.442695, %v1655_v36 }
 0x29f   :  { %2109 = vpow2.f32 %v1674_v38  ;;  %v1676_v41 = vmul.f32 1.442695, %v1657_v39 }
 0x2a0   :  { %2111 = vpow2.f32 %v1672_v40 }
 0x2a1   :  { %2113 = vpow2.f32 %v1676_v41 }
 0x2ab   :  { %v2108_v42 = vpop.eup %2107 }
 0x2ac   :  { %v2110_v43 = vpop.eup %2109  ;;  %v1702_v44 = vadd.f32 1.0, %v2108_v42  ;;  %v1394_v45 = vpop.f32.mrf.mxu0 }
 0x2ad   :  { %v2112_v46 = vpop.eup %2111  ;;  %v1704_v47 = vadd.f32 1.0, %v2110_v43  ;;  %v1395_v48 = vadd.f32 %v1394_v45, %v2487_v18  ;;  %v1435_v49 = vpop.f32.mrf.mxu1 }
 0x2ae   :  { %v2114_v51 = vpop.eup %2113  ;;  %2115 = vrcp.f32 %v1702_v44  ;;  %v1703_v52 = vadd.f32 1.0, %v2112_v46  ;;  %v1436_v53 = vadd.f32 %v1435_v49, %v2487_v18  ;;  %v1396_v54 = vpop.f32.mrf.mxu0 }
 0x2af   :  { %2117 = vrcp.f32 %v1704_v47  ;;  %v1705_v55 = vadd.f32 1.0, %v2114_v51  ;;  %v1626_v57 = vrot.slane %v1395_v48, 7  ;;  %v1397_v58 = vadd.f32 %v1396_v54, %v2487_v18  ;;  %v1437_v59 = vpop.f32.mrf.mxu1 }
 0x2b0   :  { %2119 = vrcp.f32 %v1703_v52  ;;  %v1628_v60 = vrot.slane %v1436_v53, 7  ;;  %v1438_v62 = vadd.f32 %v1437_v59, %v2487_v18  ;;  %v1398_v63 = vpop.f32.mrf.mxu0 }
 0x2b1   :  { %2121 = vrcp.f32 %v1705_v55  ;;  %v1658_v56 = vsub.f32 %v1395_v48, %v1626_v57  ;;  %v1627_v1 = vrot.slane %v1397_v58, 7  ;;  %v1439_v3 = vpop.f32.mrf.mxu1  ;;  %v2501_v48 = vsub.s32 %v1835_v30, %v1837_v31 }
 0x2b2   :  { %v1660_v4 = vsub.f32 %v1436_v53, %v1628_v60  ;;  %v1629_v61 = vrot.slane %v1438_v62, 7  ;;  %v1399_v14 = vpop.f32.mrf.mxu0 }
 0x2b3   :  { %v1678_v5 = vmul.f32 1.442695, %v1658_v56  ;;  %v1659_v6 = vsub.f32 %v1397_v58, %v1627_v1  ;;  %v1440_v7 = vpop.f32.mrf.mxu1 }
 0x2b4   :  { %v1682_v8 = vmul.f32 1.442695, %v1660_v4  ;;  %v1661_v9 = vsub.f32 %v1438_v62, %v1629_v61 }
 0x2b5   :  { %2123 = vpow2.f32 %v1678_v5  ;;  %v1680_v0 = vmul.f32 1.442695, %v1659_v6  ;;  %v1476_v10 = vpop.f32.mrf.mxu0 }
 0x2b6   :  { %2125 = vpow2.f32 %v1682_v8  ;;  %v1684_v11 = vmul.f32 1.442695, %v1661_v9  ;;  %v1477_v12 = vadd.f32 %v1476_v10, %v2487_v18  ;;  %v1517_v13 = vpop.f32.mrf.mxu1 }
 0x2b7   :  { %2127 = vpow2.f32 %v1680_v0  ;;  %v1518_v2 = vadd.f32 %v1517_v13, %v2487_v18  ;;  %v1478_v19 = vpop.f32.mrf.mxu0 }
 0x2b8   :  { %2129 = vpow2.f32 %v1684_v11  ;;  %v1630_v20 = vrot.slane %v1477_v12, 7  ;;  %v1479_v21 = vadd.f32 %v1478_v19, %v2487_v18  ;;  %v1519_v22 = vpop.f32.mrf.mxu1 }
 0x2b9   :  { %v1632_v26 = vrot.slane %v1518_v2, 7  ;;  %v1520_v23 = vadd.f32 %v1519_v22, %v2487_v18  ;;  %v1480_v24 = vpop.f32.mrf.mxu0 }
 0x2ba   :  { %v1662_v25 = vsub.f32 %v1477_v12, %v1630_v20  ;;  %v1631_v27 = vrot.slane %v1479_v21, 7  ;;  %v1521_v28 = vpop.f32.mrf.mxu1 }
 0x2bb   :  { %v2116_v29 = vpop.eup %2115  ;;  %v1664_v50 = vsub.f32 %v1518_v2, %v1632_v26  ;;  %v1633_v32 = vrot.slane %v1520_v23, 7  ;;  %v1481_v33 = vpop.f32.mrf.mxu0 }
 0x2bc   :  { %v2118_v34 = vpop.eup %2117  ;;  %v1734_v35 = vsub.f32 1.0, %v2116_v29  ;;  %v1766_v36 = vrot.slane %v2116_v29, 1  ;;  %v1686_v37 = vmul.f32 1.442695, %v1662_v25  ;;  %v1663_v38 = vsub.f32 %v1479_v21, %v1631_v27  ;;  %v1522_v39 = vpop.f32.mrf.mxu1 }
 0x2bd   :  { %v2120_v40 = vpop.eup %2119  ;;  %v1736_v41 = vsub.f32 1.0, %v2118_v34  ;;  %v1768_v42 = vrot.slane %v2118_v34, 1  ;;  %v1690_v43 = vmul.f32 1.442695, %v1664_v50  ;;  %v1665_v44 = vsub.f32 %v1520_v23, %v1633_v32 }
 0x2be   :  { %v2122_v45 = vpop.eup %2121  ;;  %v1735_v46 = vsub.f32 1.0, %v2120_v40  ;;  %v1767_v47 = vrot.slane %v2120_v40, 1  ;;  %2131 = vpow2.f32 %v1686_v37  ;;  %v1799_v52 = vsel %vm1798_vm5, %v1766_v36, %v1734_v35 }
 0x2bf   :  { %v1737_v49 = vsub.f32 1.0, %v2122_v45  ;;  %v1769_v51 = vrot.slane %v2122_v45, 1  ;;  %2133 = vpow2.f32 %v1690_v43  ;;  %v1688_v54 = vmul.f32 1.442695, %v1663_v38 }
 0x2c0   :  { %v1800_v53 = vsel %vm1798_vm5, %v1767_v47, %v1735_v46  ;;  %v1692_v55 = vmul.f32 1.442695, %v1665_v44  ;;  %v1801_v57 = vsel %vm1798_vm5, %v1768_v42, %v1736_v41 }
 0x2c1   :  { %v1831_v58 = vcombine.low %v1799_v52, %v1800_v53  ;;  %v1802_v59 = vsel %vm1798_vm5, %v1769_v51, %v1737_v49  ;;  %2135 = vpow2.f32 %v1688_v54 }
 0x2c2   :  { %v2124_v60 = vpop.eup %2123  ;;  %v1832_v62 = vcombine.low %v1801_v57, %v1802_v59  ;;  %2137 = vpow2.f32 %v1692_v55 }
 0x2c3   :  { %v2126_v63 = vpop.eup %2125  ;;  %v1839_v56 = vrot.slane %v1831_v58, %v2501_v48  ;;  %v1706_v1 = vadd.f32 1.0, %v2124_v60 }
 0x2c4   :  { %v2128_v3 = vpop.eup %2127  ;;  %v1846_v4 = vrot.slane %v1832_v62, %v2501_v48  ;;  %v1708_v61 = vadd.f32 1.0, %v2126_v63 }
 0x2c5   :  { %v2130_v14 = vpop.eup %2129  ;;  %2139 = vrcp.f32 %v1706_v1  ;;  %v1707_v5 = vadd.f32 1.0, %v2128_v3 }
 0x2c6   :  { %v1847_v6 = vcombine.low %v1839_v56, %v1846_v4  ;;  %2141 = vrcp.f32 %v1708_v61  ;;  %v1709_v7 = vadd.f32 1.0, %v2130_v14 }
 0x2c7   :  { %2143 = vrcp.f32 %v1707_v5 }
 0x2c8   :  { %1903 = vst [vmem:[%s2546_s3] sm:$0xff] %v1847_v6  ;;  %2145 = vrcp.f32 %v1709_v7 }
 0x2cb   :  { %v2132_v8 = vpop.eup %2131 }
 0x2cc   :  { %v2134_v9 = vpop.eup %2133  ;;  %v1710_v0 = vadd.f32 1.0, %v2132_v8  ;;  %v1558_v10 = vpop.f32.mrf.mxu0 }
 0x2cd   :  { %v1712_v11 = vadd.f32 1.0, %v2134_v9  ;;  %v1559_v12 = vadd.f32 %v1558_v10, %v2487_v18  ;;  %v1599_v13 = vpop.f32.mrf.mxu1 }
 0x2ce   :  { %2147 = vrcp.f32 %v1710_v0  ;;  %v1600_v15 = vadd.f32 %v1599_v13, %v2487_v18  ;;  %v1560_v16 = vpop.f32.mrf.mxu0  ;;  %v2136_v17 = vpop.eup %2135 }
 0x2cf   :  { %2149 = vrcp.f32 %v1712_v11  ;;  %v1634_v2 = vrot.slane %v1559_v12, 7  ;;  %v1561_v19 = vadd.f32 %v1560_v16, %v2487_v18  ;;  %v1601_v20 = vpop.f32.mrf.mxu1  ;;  %v2138_v21 = vpop.eup %2137  ;;  %v1711_v22 = vadd.f32 1.0, %v2136_v17 }
 0x2d0   :  { %v1636_v26 = vrot.slane %v1600_v15, 7  ;;  %v1602_v23 = vadd.f32 %v1601_v20, %v2487_v18  ;;  %v1562_v24 = vpop.f32.mrf.mxu0  ;;  %v1713_v25 = vadd.f32 1.0, %v2138_v21 }
 0x2d1   :  { %v1666_v27 = vsub.f32 %v1559_v12, %v1634_v2  ;;  %v1635_v28 = vrot.slane %v1561_v19, 7  ;;  %v1603_v29 = vpop.f32.mrf.mxu1  ;;  %2151 = vrcp.f32 %v1711_v22 }
 0x2d2   :  { %v2140_v30 = vpop.eup %2139  ;;  %v1668_v31 = vsub.f32 %v1600_v15, %v1636_v26  ;;  %v1637_v50 = vrot.slane %v1602_v23, 7  ;;  %v1563_v32 = vpop.f32.mrf.mxu0  ;;  %2153 = vrcp.f32 %v1713_v25 }
 0x2d3   :  { %v2142_v33 = vpop.eup %2141  ;;  %v1738_v34 = vsub.f32 1.0, %v2140_v30  ;;  %v1770_v35 = vrot.slane %v2140_v30, 1  ;;  %v1694_v36 = vmul.f32 1.442695, %v1666_v27  ;;  %v1604_v37 = vpop.f32.mrf.mxu1  ;;  %v1667_v41 = vsub.f32 %v1561_v19, %v1635_v28 }
 0x2d4   :  { %v2144_v38 = vpop.eup %2143  ;;  %v1740_v39 = vsub.f32 1.0, %v2142_v33  ;;  %v1772_v40 = vrot.slane %v2142_v33, 1  ;;  %v1698_v18 = vmul.f32 1.442695, %v1668_v31  ;;  %v1669_v52 = vsub.f32 %v1602_v23, %v1637_v50 }
 0x2d5   :  { %v2146_v42 = vpop.eup %2145  ;;  %v1739_v43 = vsub.f32 1.0, %v2144_v38  ;;  %v1771_v44 = vrot.slane %v2144_v38, 1  ;;  %2155 = vpow2.f32 %v1694_v36  ;;  %v1803_v47 = vsel %vm1798_vm5, %v1770_v35, %v1738_v34 }
 0x2d6   :  { %v1741_v45 = vsub.f32 1.0, %v2146_v42  ;;  %v1773_v46 = vrot.slane %v2146_v42, 1  ;;  %2157 = vpow2.f32 %v1698_v18  ;;  %v1696_v51 = vmul.f32 1.442695, %v1667_v41 }
 0x2d7   :  { %v1804_v49 = vsel %vm1798_vm5, %v1771_v44, %v1739_v43  ;;  %v1805_v53 = vsel %vm1798_vm5, %v1772_v40, %v1740_v39  ;;  %v1700_v58 = vmul.f32 1.442695, %v1669_v52 }
 0x2d8   :  { %v1848_v54 = vcombine.low %v1803_v47, %v1804_v49  ;;  %v1806_v55 = vsel %vm1798_vm5, %v1773_v46, %v1741_v45  ;;  %2159 = vpow2.f32 %v1696_v51 }
 0x2d9   :  { %v1849_v57 = vcombine.low %v1805_v53, %v1806_v55  ;;  %2161 = vpow2.f32 %v1700_v58 }
 0x2da   :  { %v1856_v59 = vrot.slane %v1848_v54, %v2501_v48 }
 0x2db   :  { %v2148_v60 = vpop.eup %2147  ;;  %v1863_v62 = vrot.slane %v1849_v57, %v2501_v48 }
 0x2dc   :  { %v2150_v63 = vpop.eup %2149  ;;  %v1742_v1 = vsub.f32 1.0, %v2148_v60  ;;  %v1774_v3 = vrot.slane %v2148_v60, 1 }
 0x2dd   :  { %v1864_v56 = vcombine.low %v1856_v59, %v1863_v62  ;;  %v1744_v61 = vsub.f32 1.0, %v2150_v63  ;;  %v1776_v14 = vrot.slane %v2150_v63, 1 }
 0x2de   :  { %v2152_v4 = vpop.eup %2151  ;;  %v1807_v10 = vsel %vm1798_vm5, %v1774_v3, %v1742_v1 }
 0x2df   :  { %1904 = vst [vmem:[%s2546_s3 + $0x8] sm:$0xff] %v1864_v56  ;;  %v2154_v5 = vpop.eup %2153  ;;  %v1743_v6 = vsub.f32 1.0, %v2152_v4  ;;  %v1775_v7 = vrot.slane %v2152_v4, 1  ;;  %v1809_v13 = vsel %vm1798_vm5, %v1776_v14, %v1744_v61 }
 0x2e0   :  { %v1745_v8 = vsub.f32 1.0, %v2154_v5  ;;  %v1777_v9 = vrot.slane %v2154_v5, 1 }
 0x2e1   :  { %v1808_v11 = vsel %vm1798_vm5, %v1775_v7, %v1743_v6 }
 0x2e2   :  { %v2156_v0 = vpop.eup %2155  ;;  %v1865_v15 = vcombine.low %v1807_v10, %v1808_v11  ;;  %v1810_v16 = vsel %vm1798_vm5, %v1777_v9, %v1745_v8 }
 0x2e3   :  { %v2158_v12 = vpop.eup %2157  ;;  %v1714_v17 = vadd.f32 1.0, %v2156_v0  ;;  %v1866_v2 = vcombine.low %v1809_v13, %v1810_v16 }
 0x2e4   :  { %v1716_v19 = vadd.f32 1.0, %v2158_v12  ;;  %v1873_v20 = vrot.slane %v1865_v15, %v2501_v48 }
 0x2e5   :  { %2163 = vrcp.f32 %v1714_v17  ;;  %v2160_v21 = vpop.eup %2159  ;;  %v1880_v22 = vrot.slane %v1866_v2, %v2501_v48 }
 0x2e6   :  { %2165 = vrcp.f32 %v1716_v19  ;;  %v1715_v26 = vadd.f32 1.0, %v2160_v21  ;;  %v2162_v23 = vpop.eup %2161 }
 0x2e7   :  { %v1881_v24 = vcombine.low %v1873_v20, %v1880_v22  ;;  %v1717_v25 = vadd.f32 1.0, %v2162_v23 }
 0x2e8   :  { %2167 = vrcp.f32 %v1715_v26 }
 0x2e9   :  { %1905 = vst [vmem:[%s2546_s3 + $0x10] sm:$0xff] %v1881_v24  ;;  %2169 = vrcp.f32 %v1717_v25 }
 0x2f2   :  { %v2164_v27 = vpop.eup %2163 }
 0x2f3   :  { %v2166_v28 = vpop.eup %2165  ;;  %v1746_v29 = vsub.f32 1.0, %v2164_v27  ;;  %v1778_v30 = vrot.slane %v2164_v27, 1 }
 0x2f4   :  { %v1748_v50 = vsub.f32 1.0, %v2166_v28  ;;  %v1780_v32 = vrot.slane %v2166_v28, 1 }
 0x2f5   :  { %v2168_v31 = vpop.eup %2167  ;;  %v1811_v36 = vsel %vm1798_vm5, %v1778_v30, %v1746_v29 }
 0x2f6   :  { %v1747_v33 = vsub.f32 1.0, %v2168_v31  ;;  %v1779_v34 = vrot.slane %v2168_v31, 1  ;;  %v2170_v35 = vpop.eup %2169  ;;  %v1813_v18 = vsel %vm1798_vm5, %v1780_v32, %v1748_v50 }
 0x2f7   :  { %v1749_v38 = vsub.f32 1.0, %v2170_v35  ;;  %v1781_v39 = vrot.slane %v2170_v35, 1 }
 0x2f8   :  { %v1812_v37 = vsel %vm1798_vm5, %v1779_v34, %v1747_v33 }
 0x2f9   :  { %v1882_v40 = vcombine.low %v1811_v36, %v1812_v37  ;;  %v1814_v41 = vsel %vm1798_vm5, %v1781_v39, %v1749_v38 }
 0x2fa   :  { %v1883_v43 = vcombine.low %v1813_v18, %v1814_v41 }
 0x2fb   :  { %v1890_v42 = vrot.slane %v1882_v40, %v2501_v48 }
 0x2fc   :  { %v1897_v44 = vrot.slane %v1883_v43, %v2501_v48 }
 0x2fe   :  { %v1898_v45 = vcombine.low %v1890_v42, %v1897_v44 }
 0x300   :  { %1906 = vst [vmem:[%s2546_s3 + $0x18] sm:$0xff] %v1898_v45 }

</bundles_post_ra>
